<compile_context>
chip_gen: v7x
topology: tpu7x:2x2x1
jax: 0.10.0
libtpu: 0.0.40
codegen_flags: <defaults>
</compile_context>

<pallas_src>
import math
from functools import partial

import jax
import jax.numpy as jnp
from jax.experimental import pallas as pl
from jax.experimental.pallas import tpu as pltpu

TAU = 2.0 * math.pi
INV_TAU = 1.0 / TAU


def _sin_poly(r, r2):
    """sin(r) for r in [-pi, pi]; odd Taylor up to r^13 (|err| < ~3e-5)."""
    p = r2 * (1.0 / 6227020800.0) - 1.0 / 39916800.0
    p = r2 * p + 1.0 / 362880.0
    p = r2 * p - 1.0 / 5040.0
    p = r2 * p + 1.0 / 120.0
    p = r2 * p - 1.0 / 6.0
    return r + r * (r2 * p)


def _cos_poly(r2):
    """cos(r) for r in [-pi, pi]; even Taylor up to r^14 (|err| < ~5e-6)."""
    q = r2 * (-1.0 / 87178291200.0) + 1.0 / 479001600.0
    q = r2 * q - 1.0 / 3628800.0
    q = r2 * q + 1.0 / 40320.0
    q = r2 * q - 1.0 / 720.0
    q = r2 * q + 1.0 / 24.0
    q = r2 * q - 0.5
    return 1.0 + r2 * q


def harmonic_kernel(params_ref, tri_ref, start_ref, f_ref, n_ref, o_ref, *,
                    num_harmonics):
    # params_ref (SMEM, 1D f32):
    #   [0] sin(phi)  [1] cos(phi)  [2] bias  [3] alpha/(3*sigma)
    #   [4] sigma * sum_h w_h  [5:8] pad  [8+h] alpha * w_h
    sin_phi = params_ref[0]
    cos_phi = params_ref[1]
    bias = params_ref[2]
    unv_gain = params_ref[3]
    noise_w = params_ref[4]

    f = f_ref[...]                                              # (M, 128)

    # Intra-sub-chunk inclusive cumsum via resident c-scaled upper-triangular
    # matrix (MXU, f32 accumulate); cross-chunk prefix comes in precomputed.
    cum = jnp.dot(f, tri_ref[...], preferred_element_type=jnp.float32)
    theta = start_ref[...] + cum                                # (M, 128) radians

    uv = (f > 0.0).astype(jnp.float32)                          # voiced mask

    # Single range reduction to [-pi, pi], then one sin + one cos polynomial.
    k = jnp.floor(theta * INV_TAU + 0.5)
    r = theta - k * TAU
    r2 = r * r
    sin_r = _sin_poly(r, r2)
    cos_r = _cos_poly(r2)

    # Chebyshev recurrence: S_h = sin(h*theta + phi),
    #   S_0 = sin(phi), S_1 = sin(theta + phi), S_{h+1} = 2 cos(theta) S_h - S_{h-1}
    s_prev = sin_phi                                            # scalar S_0
    s_cur = sin_r * cos_phi + cos_r * sin_phi                   # S_1, (M, 128)
    twoc = cos_r + cos_r
    acc = params_ref[8] * s_cur
    for h in range(1, num_harmonics):                           # static unroll
        s_next = twoc * s_cur - s_prev
        acc = acc + params_ref[8 + h] * s_next
        s_prev, s_cur = s_cur, s_next

    # Noise term factored out of the H broadcast (sum_h w_h folded into noise_w).
    noise_term = (uv + (1.0 - uv) * unv_gain) * (noise_w * n_ref[...])

    o_ref[...] = jnp.tanh(uv * acc + noise_term + bias)


def harmonic_forward(f, noise, params, c, *, rows_per_step=64):
    """f, noise: (B, 1, T) f32; params: (8 + H,) f32 (see kernel) -> (B, 1, T).

    c = tau / sample_rate.
    """
    B, ch, T = f.shape
    assert ch == 1
    H = params.shape[0] - 8

    L = 128                                   # lanes per sub-chunk
    n_sub = pl.cdiv(T, L)                     # number of 128-sample sub-chunks
    M = min(rows_per_step, 8 * pl.cdiv(n_sub, 8))   # sub-chunks (sublanes) / step
    n_sub_p = pl.cdiv(n_sub, M) * M
    Tp = n_sub_p * L

    f2 = jnp.pad(f.reshape(B, T).astype(jnp.float32), ((0, 0), (0, Tp - T)))
    n2 = jnp.pad(noise.reshape(B, T).astype(jnp.float32), ((0, 0), (0, Tp - T)))
    f3 = f2.reshape(B, n_sub_p, L)
    n3 = n2.reshape(B, n_sub_p, L)

    # Host-side prefix pass (O(T/128) after the reduce): exclusive per-sub-chunk
    # start phase, wrapped mod 2*pi (exact for integer harmonic multipliers).
    row_sums = jnp.sum(f3, axis=-1)                             # (B, n_sub_p)
    excl = jnp.cumsum(row_sums, axis=-1) - row_sums
    start = jnp.float32(c) * excl
    start = start - TAU * jnp.floor(start * INV_TAU)
    start = start[..., None].astype(jnp.float32)                # (B, n_sub_p, 1)

    # Resident c-scaled upper-triangular (inclusive) cumsum matrix; constant
    # index_map so it is DMA'd once per core and stays resident in VMEM.
    tri = (jnp.arange(L)[:, None] <= jnp.arange(L)[None, :]).astype(
        jnp.float32) * jnp.float32(c)

    n_steps = n_sub_p // M
    kernel = partial(harmonic_kernel, num_harmonics=H)

    out3 = pl.pallas_call(
        kernel,
        out_shape=jax.ShapeDtypeStruct((B, n_sub_p, L), jnp.float32),
        grid=(B, n_steps),
        in_specs=[
            pl.BlockSpec(memory_space=pltpu.MemorySpace.SMEM),      # scalars
            pl.BlockSpec((L, L), lambda b, j: (0, 0)),              # tri (resident)
            pl.BlockSpec((None, M, 1), lambda b, j: (b, j, 0)),     # start phases
            pl.BlockSpec((None, M, L), lambda b, j: (b, j, 0)),     # f0
            pl.BlockSpec((None, M, L), lambda b, j: (b, j, 0)),     # noise
        ],
        out_specs=pl.BlockSpec((None, M, L), lambda b, j: (b, j, 0)),
        compiler_params=pltpu.CompilerParams(
            dimension_semantics=("parallel", "parallel")),
    )(params, tri, start, f3, n3)

    return out3.reshape(B, Tp)[:, :T].reshape(B, 1, T)


def build_params(alpha, sigma, phi, bias, w):
    """Pack Harmonic's parameters into the SMEM scalar vector."""
    w_row = jnp.asarray(w, jnp.float32).reshape(-1)              # (H,)
    head = jnp.array(
        [math.sin(phi), math.cos(phi), bias, alpha / (3.0 * sigma),
         sigma * float(jnp.sum(w_row)), 0.0, 0.0, 0.0],
        dtype=jnp.float32)
    return jnp.concatenate([head, (alpha * w_row).astype(jnp.float32)])


if __name__ == "__main__":
    key = jax.random.PRNGKey(0)
    kphi, kw, kb, kf, kv, kn = jax.random.split(key, 6)

    B, T = 2, 1024
    sample_rate = 16000
    H = 7

    # Deterministic parameter init (shapes match Harmonic.__init__).
    alpha = 0.1
    sigma = 0.003
    phi = float(-math.pi + TAU * jax.random.uniform(kphi, ()))   # phi ~ U(-pi, pi)
    bound = 1.0 / math.sqrt(H)                                   # nn.Linear(H, 1) init
    w = jax.random.uniform(kw, (1, H), minval=-bound, maxval=bound,
                           dtype=jnp.float32)
    b = float(jax.random.uniform(kb, (), minval=-bound, maxval=bound))
    c = TAU / sample_rate

    params = build_params(alpha, sigma, phi, b, w)

    # f0 track: positive in voiced regions, zero in unvoiced regions.
    f0 = jax.random.uniform(kf, (B, 1, T), minval=80.0, maxval=400.0)
    voiced = (jax.random.uniform(kv, (B, 1, T)) > 0.3).astype(jnp.float32)
    f0 = (f0 * voiced).astype(jnp.float32)

    # Standard-normal noise drawn host-side (see TODO above).
    noise = jax.random.normal(kn, (B, 1, T), dtype=jnp.float32)

    out = jax.block_until_ready(harmonic_forward(f0, noise, params, c))

    # Pure-JAX reference of the PyTorch forward (same noise draw).
    harmonics = jnp.arange(1, H + 1, dtype=jnp.float32)[None, :, None]
    x = c * jnp.cumsum(harmonics * f0, axis=-1)
    uv = (f0 > 0).astype(jnp.float32)
    noise_scale = uv + (1 - uv) * (alpha / (3 * sigma))
    harmonic_scale = uv * alpha
    e = harmonic_scale * jnp.sin(x + phi) + noise_scale * (sigma * noise)
    ref = jnp.tanh(jnp.einsum("bht,oh->bot", e, w) + b)

    assert out.shape == (B, 1, T) and out.dtype == jnp.float32
    err = float(jnp.max(jnp.abs(out - ref)))
    assert err < 5e-3, f"max abs error {err}"
    print("KERNEL_OK")
</pallas_src>

<mosaic_0001>
module attributes {stable_mosaic.version = 11 : i64} {
  func.func @harmonic_kernel(%arg0: i32, %arg1: i32, %arg2: memref<15xf32, #tpu.memory_space<smem>>, %arg3: memref<128x128xf32, #tpu.memory_space<vmem>>, %arg4: memref<1x8x1xf32, #tpu.memory_space<vmem>>, %arg5: memref<1x8x128xf32, #tpu.memory_space<vmem>>, %arg6: memref<1x8x128xf32, #tpu.memory_space<vmem>>, %arg7: memref<1x8x128xf32, #tpu.memory_space<vmem>>) attributes {dimension_semantics = [#tpu.dimension_semantics<parallel>, #tpu.dimension_semantics<parallel>], iteration_bounds = array<i64: 2, 1>, scalar_prefetch = 0 : i64, scratch_operands = 0 : i64, tpu.core_type = #tpu.core_type<tc>, window_params = [{transform_indices = @transform_0, window_bounds = array<i64: 15>}, {pipeline_mode = #tpu.pipeline_mode<synchronous>, transform_indices = @transform_1, window_bounds = array<i64: 128, 128>}, {transform_indices = @transform_2, window_bounds = array<i64: 1, 8, 1>}, {transform_indices = @transform_3, window_bounds = array<i64: 1, 8, 128>}, {transform_indices = @transform_4, window_bounds = array<i64: 1, 8, 128>}, {transform_indices = @transform_5, window_bounds = array<i64: 1, 8, 128>}]} {
    %c0 = arith.constant 0 : index
    %0 = memref.load %arg2[%c0] : memref<15xf32, #tpu.memory_space<smem>>
    %c1 = arith.constant 1 : index
    %1 = memref.load %arg2[%c1] : memref<15xf32, #tpu.memory_space<smem>>
    %c2 = arith.constant 2 : index
    %2 = memref.load %arg2[%c2] : memref<15xf32, #tpu.memory_space<smem>>
    %c3 = arith.constant 3 : index
    %3 = memref.load %arg2[%c3] : memref<15xf32, #tpu.memory_space<smem>>
    %c4 = arith.constant 4 : index
    %4 = memref.load %arg2[%c4] : memref<15xf32, #tpu.memory_space<smem>>
    %c0_0 = arith.constant 0 : index
    %c0_1 = arith.constant 0 : index
    %c0_2 = arith.constant 0 : index
    %5 = vector.load %arg5[%c0_0, %c0_1, %c0_2] : memref<1x8x128xf32, #tpu.memory_space<vmem>>, vector<1x8x128xf32>
    %6 = vector.shape_cast %5 : vector<1x8x128xf32> to vector<8x128xf32>
    %c0_3 = arith.constant 0 : index
    %c0_4 = arith.constant 0 : index
    %7 = vector.load %arg3[%c0_3, %c0_4] : memref<128x128xf32, #tpu.memory_space<vmem>>, vector<128x128xf32>
    %cst = arith.constant dense<0.000000e+00> : vector<8x128xf32>
    %8 = tpu.matmul %6, %7, %cst {dimension_numbers = #tpu.dot_dimension_numbers<[1], [0], [0], [1], [0, 0, 1, 1], [], []>} : vector<8x128xf32>, vector<128x128xf32>, vector<8x128xf32> -> vector<8x128xf32>
    %c0_5 = arith.constant 0 : index
    %c0_6 = arith.constant 0 : index
    %c0_7 = arith.constant 0 : index
    %9 = vector.load %arg4[%c0_5, %c0_6, %c0_7] : memref<1x8x1xf32, #tpu.memory_space<vmem>>, vector<1x8x1xf32>
    %10 = vector.shape_cast %9 : vector<1x8x1xf32> to vector<8x1xf32>
    %11 = vector.broadcast %10 : vector<8x1xf32> to vector<8x128xf32>
    %12 = arith.addf %11, %8 : vector<8x128xf32>
    %cst_8 = arith.constant 0.000000e+00 : f32
    %13 = vector.broadcast %cst_8 : f32 to vector<8x128xf32>
    %14 = arith.cmpf ogt, %6, %13 : vector<8x128xf32>
    %15 = arith.extui %14 : vector<8x128xi1> to vector<8x128xi32>
    %16 = arith.sitofp %15 : vector<8x128xi32> to vector<8x128xf32>
    %cst_9 = arith.constant 0.159154937 : f32
    %17 = vector.broadcast %cst_9 : f32 to vector<8x128xf32>
    %18 = arith.mulf %12, %17 : vector<8x128xf32>
    %cst_10 = arith.constant 5.000000e-01 : f32
    %19 = vector.broadcast %cst_10 : f32 to vector<8x128xf32>
    %20 = arith.addf %18, %19 : vector<8x128xf32>
    %21 = math.floor %20 : vector<8x128xf32>
    %cst_11 = arith.constant 6.28318548 : f32
    %22 = vector.broadcast %cst_11 : f32 to vector<8x128xf32>
    %23 = arith.mulf %21, %22 : vector<8x128xf32>
    %24 = arith.subf %12, %23 : vector<8x128xf32>
    %25 = arith.mulf %24, %24 : vector<8x128xf32>
    %cst_12 = arith.constant 1.60590444E-10 : f32
    %26 = vector.broadcast %cst_12 : f32 to vector<8x128xf32>
    %27 = arith.mulf %25, %26 : vector<8x128xf32>
    %cst_13 = arith.constant 2.50521079E-8 : f32
    %28 = vector.broadcast %cst_13 : f32 to vector<8x128xf32>
    %29 = arith.subf %27, %28 : vector<8x128xf32>
    %30 = arith.mulf %25, %29 : vector<8x128xf32>
    %cst_14 = arith.constant 2.75573188E-6 : f32
    %31 = vector.broadcast %cst_14 : f32 to vector<8x128xf32>
    %32 = arith.addf %30, %31 : vector<8x128xf32>
    %33 = arith.mulf %25, %32 : vector<8x128xf32>
    %cst_15 = arith.constant 1.98412701E-4 : f32
    %34 = vector.broadcast %cst_15 : f32 to vector<8x128xf32>
    %35 = arith.subf %33, %34 : vector<8x128xf32>
    %36 = arith.mulf %25, %35 : vector<8x128xf32>
    %cst_16 = arith.constant 0.00833333377 : f32
    %37 = vector.broadcast %cst_16 : f32 to vector<8x128xf32>
    %38 = arith.addf %36, %37 : vector<8x128xf32>
    %39 = arith.mulf %25, %38 : vector<8x128xf32>
    %cst_17 = arith.constant 0.166666672 : f32
    %40 = vector.broadcast %cst_17 : f32 to vector<8x128xf32>
    %41 = arith.subf %39, %40 : vector<8x128xf32>
    %42 = arith.mulf %25, %41 : vector<8x128xf32>
    %43 = arith.mulf %24, %42 : vector<8x128xf32>
    %44 = arith.addf %24, %43 : vector<8x128xf32>
    %cst_18 = arith.constant -1.14707454E-11 : f32
    %45 = vector.broadcast %cst_18 : f32 to vector<8x128xf32>
    %46 = arith.mulf %25, %45 : vector<8x128xf32>
    %cst_19 = arith.constant 2.08767559E-9 : f32
    %47 = vector.broadcast %cst_19 : f32 to vector<8x128xf32>
    %48 = arith.addf %46, %47 : vector<8x128xf32>
    %49 = arith.mulf %25, %48 : vector<8x128xf32>
    %cst_20 = arith.constant 2.755732E-7 : f32
    %50 = vector.broadcast %cst_20 : f32 to vector<8x128xf32>
    %51 = arith.subf %49, %50 : vector<8x128xf32>
    %52 = arith.mulf %25, %51 : vector<8x128xf32>
    %cst_21 = arith.constant 2.48015876E-5 : f32
    %53 = vector.broadcast %cst_21 : f32 to vector<8x128xf32>
    %54 = arith.addf %52, %53 : vector<8x128xf32>
    %55 = arith.mulf %25, %54 : vector<8x128xf32>
    %cst_22 = arith.constant 0.00138888892 : f32
    %56 = vector.broadcast %cst_22 : f32 to vector<8x128xf32>
    %57 = arith.subf %55, %56 : vector<8x128xf32>
    %58 = arith.mulf %25, %57 : vector<8x128xf32>
    %cst_23 = arith.constant 0.0416666679 : f32
    %59 = vector.broadcast %cst_23 : f32 to vector<8x128xf32>
    %60 = arith.addf %58, %59 : vector<8x128xf32>
    %61 = arith.mulf %25, %60 : vector<8x128xf32>
    %cst_24 = arith.constant 5.000000e-01 : f32
    %62 = vector.broadcast %cst_24 : f32 to vector<8x128xf32>
    %63 = arith.subf %61, %62 : vector<8x128xf32>
    %64 = arith.mulf %25, %63 : vector<8x128xf32>
    %cst_25 = arith.constant 1.000000e+00 : f32
    %65 = vector.broadcast %cst_25 : f32 to vector<8x128xf32>
    %66 = arith.addf %65, %64 : vector<8x128xf32>
    %67 = vector.broadcast %1 : f32 to vector<8x128xf32>
    %68 = arith.mulf %44, %67 : vector<8x128xf32>
    %69 = vector.broadcast %0 : f32 to vector<8x128xf32>
    %70 = arith.mulf %66, %69 : vector<8x128xf32>
    %71 = arith.addf %68, %70 : vector<8x128xf32>
    %72 = arith.addf %66, %66 : vector<8x128xf32>
    %c8 = arith.constant 8 : index
    %73 = memref.load %arg2[%c8] : memref<15xf32, #tpu.memory_space<smem>>
    %74 = vector.broadcast %73 : f32 to vector<8x128xf32>
    %75 = arith.mulf %74, %71 : vector<8x128xf32>
    %76 = arith.mulf %72, %71 : vector<8x128xf32>
    %77 = vector.broadcast %0 : f32 to vector<8x128xf32>
    %78 = arith.subf %76, %77 : vector<8x128xf32>
    %c9 = arith.constant 9 : index
    %79 = memref.load %arg2[%c9] : memref<15xf32, #tpu.memory_space<smem>>
    %80 = vector.broadcast %79 : f32 to vector<8x128xf32>
    %81 = arith.mulf %80, %78 : vector<8x128xf32>
    %82 = arith.addf %75, %81 : vector<8x128xf32>
    %83 = arith.mulf %72, %78 : vector<8x128xf32>
    %84 = arith.subf %83, %71 : vector<8x128xf32>
    %c10 = arith.constant 10 : index
    %85 = memref.load %arg2[%c10] : memref<15xf32, #tpu.memory_space<smem>>
    %86 = vector.broadcast %85 : f32 to vector<8x128xf32>
    %87 = arith.mulf %86, %84 : vector<8x128xf32>
    %88 = arith.addf %82, %87 : vector<8x128xf32>
    %89 = arith.mulf %72, %84 : vector<8x128xf32>
    %90 = arith.subf %89, %78 : vector<8x128xf32>
    %c11 = arith.constant 11 : index
    %91 = memref.load %arg2[%c11] : memref<15xf32, #tpu.memory_space<smem>>
    %92 = vector.broadcast %91 : f32 to vector<8x128xf32>
    %93 = arith.mulf %92, %90 : vector<8x128xf32>
    %94 = arith.addf %88, %93 : vector<8x128xf32>
    %95 = arith.mulf %72, %90 : vector<8x128xf32>
    %96 = arith.subf %95, %84 : vector<8x128xf32>
    %c12 = arith.constant 12 : index
    %97 = memref.load %arg2[%c12] : memref<15xf32, #tpu.memory_space<smem>>
    %98 = vector.broadcast %97 : f32 to vector<8x128xf32>
    %99 = arith.mulf %98, %96 : vector<8x128xf32>
    %100 = arith.addf %94, %99 : vector<8x128xf32>
    %101 = arith.mulf %72, %96 : vector<8x128xf32>
    %102 = arith.subf %101, %90 : vector<8x128xf32>
    %c13 = arith.constant 13 : index
    %103 = memref.load %arg2[%c13] : memref<15xf32, #tpu.memory_space<smem>>
    %104 = vector.broadcast %103 : f32 to vector<8x128xf32>
    %105 = arith.mulf %104, %102 : vector<8x128xf32>
    %106 = arith.addf %100, %105 : vector<8x128xf32>
    %107 = arith.mulf %72, %102 : vector<8x128xf32>
    %108 = arith.subf %107, %96 : vector<8x128xf32>
    %c14 = arith.constant 14 : index
    %109 = memref.load %arg2[%c14] : memref<15xf32, #tpu.memory_space<smem>>
    %110 = vector.broadcast %109 : f32 to vector<8x128xf32>
    %111 = arith.mulf %110, %108 : vector<8x128xf32>
    %112 = arith.addf %106, %111 : vector<8x128xf32>
    %cst_26 = arith.constant 1.000000e+00 : f32
    %113 = vector.broadcast %cst_26 : f32 to vector<8x128xf32>
    %114 = arith.subf %113, %16 : vector<8x128xf32>
    %115 = vector.broadcast %3 : f32 to vector<8x128xf32>
    %116 = arith.mulf %114, %115 : vector<8x128xf32>
    %117 = arith.addf %16, %116 : vector<8x128xf32>
    %c0_27 = arith.constant 0 : index
    %c0_28 = arith.constant 0 : index
    %c0_29 = arith.constant 0 : index
    %118 = vector.load %arg6[%c0_27, %c0_28, %c0_29] : memref<1x8x128xf32, #tpu.memory_space<vmem>>, vector<1x8x128xf32>
    %119 = vector.shape_cast %118 : vector<1x8x128xf32> to vector<8x128xf32>
    %120 = vector.broadcast %4 : f32 to vector<8x128xf32>
    %121 = arith.mulf %120, %119 : vector<8x128xf32>
    %122 = arith.mulf %117, %121 : vector<8x128xf32>
    %123 = arith.mulf %16, %112 : vector<8x128xf32>
    %124 = arith.addf %123, %122 : vector<8x128xf32>
    %125 = vector.broadcast %2 : f32 to vector<8x128xf32>
    %126 = arith.addf %124, %125 : vector<8x128xf32>
    %127 = math.tanh %126 : vector<8x128xf32>
    %c0_30 = arith.constant 0 : index
    %c0_31 = arith.constant 0 : index
    %c0_32 = arith.constant 0 : index
    %128 = vector.load %arg7[%c0_30, %c0_31, %c0_32] : memref<1x8x128xf32, #tpu.memory_space<vmem>>, vector<1x8x128xf32>
    %129 = vector.shape_cast %128 : vector<1x8x128xf32> to vector<8x128xf32>
    %130 = vector.shape_cast %127 : vector<8x128xf32> to vector<1x8x128xf32>
    tpu.vector_store %arg7[%c0_30, %c0_31, %c0_32], %130 {strides = array<i32>} : memref<1x8x128xf32, #tpu.memory_space<vmem>>, vector<1x8x128xf32>,
    return
  }
  func.func @transform_0(%arg0: i32, %arg1: i32) -> i32 {
    %c0_i32 = arith.constant 0 : i32
    %c0_i32_0 = arith.constant 0 : i32
    return %c0_i32 : i32
  }
  func.func @transform_1(%arg0: i32, %arg1: i32) -> (i32, i32) {
    %c0_i32 = arith.constant 0 : i32
    %c0_i32_0 = arith.constant 0 : i32
    %c0_i32_1 = arith.constant 0 : i32
    return %c0_i32, %c0_i32_0 : i32, i32
  }
  func.func @transform_2(%arg0: i32, %arg1: i32) -> (i32, i32, i32) {
    %c0_i32 = arith.constant 0 : i32
    %c0_i32_0 = arith.constant 0 : i32
    return %arg0, %arg1, %c0_i32 : i32, i32, i32
  }
  func.func @transform_3(%arg0: i32, %arg1: i32) -> (i32, i32, i32) {
    %c0_i32 = arith.constant 0 : i32
    %c0_i32_0 = arith.constant 0 : i32
    return %arg0, %arg1, %c0_i32 : i32, i32, i32
  }
  func.func @transform_4(%arg0: i32, %arg1: i32) -> (i32, i32, i32) {
    %c0_i32 = arith.constant 0 : i32
    %c0_i32_0 = arith.constant 0 : i32
    return %arg0, %arg1, %c0_i32 : i32, i32, i32
  }
  func.func @transform_5(%arg0: i32, %arg1: i32) -> (i32, i32, i32) {
    %c0_i32 = arith.constant 0 : i32
    %c0_i32_0 = arith.constant 0 : i32
    return %arg0, %arg1, %c0_i32 : i32, i32, i32
  }
}

</mosaic_0001>

<bundles_post_ra>
// kernel: tpu_custom_call.1
= control target key start
LH: loop header
LB: loop body
LE: loop exit
PB: predicated region body
PF: predicated region fallthrough
CT: control target
= control target key end

     0   :  { %10 = vsyncpa [#allocation5], 0  ;;  %s1222_s0 = inlined_call_operand.vmem [shape: f32[15], index: 0, kind: input, shape index: {}]   ;;  %s1223_s1 = inlined_call_operand.hbm [shape: f32[128,128], index: 1, kind: input, shape index: {}]   ;;  %s1224_s2 = inlined_call_operand.vmem [shape: f32[2,8,1], index: 2, kind: input, shape index: {}]   ;;  %s1225_s3 = inlined_call_operand.vmem [shape: f32[2,8,128], index: 3, kind: input, shape index: {}]   ;;  %s1226_s4 = inlined_call_operand.vmem [shape: f32[2,8,128], index: 4, kind: input, shape index: {}]   ;;  %s1227_s5 = inlined_call_operand.hbm [shape: f32[2,8,128], index: 5, kind: output, shape index: {}]  }
   0x1   :  { %11 = vsyncpa [#allocation3], 0 }
   0x2   :  { %12 = vsyncpa [#allocation4], 0 }
   0x3   :  { %14 = vsyncpa [#allocation4 + $0x1], 0  ;;  %s1030_s18 = smov 0   ;;  %s1032_s19 = smov 0  }
   0x4   :  { %s1034_s20 = smov 0   ;;  %s1036_s21 = smov 0  }
   0x5   :  { %s1038_s22 = smov 0   ;;  %s1040_s23 = smov 0  }
   0x6 LB: > { %s664_s24 = sadd.s32 4294967295, %s989_s23   ;;  %s665_s25 = sadd.s32 4294967294, %s989_s23   ;;  %s989_s23 = sphi %s1040_s23, %s20_s23   ;;  %s985_s22 = sphi %s1038_s22, %s1240_s22   ;;  %s981_s21 = sphi %s1036_s21, %s1239_s21   ;;  %s977_s20 = sphi %s1034_s20, %s1238_s20   ;;  %s973_s19 = sphi %s1032_s19, %s1237_s19   ;;  %s969_s18 = sphi %s1030_s18, %s1236_s18  }
   0x7   : > { %s32_s26 = sadd.s32 1, %s985_s22  ;;  %s167_s27 = sadd.s32 1, %s977_s20 }
   0x8   : > { %p34_p0 = scmp.ge.s32.totalorder %s32_s26, 2  ;;  %p177_p1 = scmp.ne.s32.totalorder %s977_s20, %s973_s19 }
   0x9   : > { %p178_p2 = scmp.eq.s32.totalorder %s664_s24, 1  ;;  %p183_p3 = scmp.ne.s32.totalorder %s973_s19, %s969_s18 }
   0xa   : > { %s1242_s26 = smov (%p34_p0, %s32_s26), 0  ;;  %p184_p5 = scmp.eq.s32.totalorder %s665_s25, 1 }
   0xb   : > { %p1070_p4 = por %p178_p2, %p177_p1  ;;  %s162_s29 = ssub.s32 %s985_s22, %s1242_s26 }
   0xc   : > { %p666_p6 = scmp.ge.s32.totalorder %s989_s23, 1  ;;  %p165_p7 = scmp.eq.s32.totalorder %s162_s29, 0 }
   0xd   : > { %s1229_s28 = scalar_select %p1070_p4, 1, 0 }
   0xe   : > { %p1077_p8 = por %p184_p5, %p183_p3  ;;  %p191_p9 = scmp.lt.s32.totalorder %s989_s23, 3 }
   0xf   : > { %s1083_s6 = scalar_select %p165_p7, %s977_s20, %s167_s27  }
  0x10   : > { %s1230_s30 = scalar_select %p1077_p8, 1, 0 }
  0x11   : > { %p1085_p10 = pnand %p666_p6, %p191_p9  ;;  %p1089_p11 = scmp.eq.s32.totalorder %s664_s24, 0 }
  0x12   : > { %s204_s11 = sshll.u32 %s1222_s0, 4  ;;  %s991_s13 = smov [#allocation6]   ;;  %s205_s11 = int_to_ptr.vmem [resolvable:$true] %s204_s11 }
  0x13   : > { %p785_p12 = pneg %p1085_p10  ;;  %s214_s14 = sshll.u32 %s991_s13, 4  ;;  %s1104_s14 = int_to_ptr.vmem [resolvable:$true] %s214_s14 }
  0x14   : > { %s860_s15 = scalar_lea.vmem %s205_s11, 16  ;;  %p868_p5 = scmp.lt.s32.totalorder %s205_s11, %s205_s11 }
  0x15   : > { %p1100_p13 = pnand %p1089_p11, %p785_p12  ;;  %p861_p0 = scmp.ne.s32.totalorder %s205_s11, %s860_s15 }
  0x16   : > { %p869_p6 = scmp.lt.s32.totalorder %s860_s15, %s860_s15 }
  0x17   : > { %p862_p1 = pneg %p1100_p13 }
  0x18   : > { %p870_p7 = por %p869_p6, %p868_p5 }
  0x19   : > { %p863_p2 = pnand %p862_p1, %p861_p0 }
  0x1b   : > { %p864_p3 = pneg %p863_p2 }
  0x1d   : > { %p871_p9 = pnand %p870_p7, %p864_p3 }
  0x1f   : > { %874 = shalt.err (!%p871_p9)
}
  0x20   : > { %s992_s16 = smov [#allocation2]   ;;  %s875_s25 = scalar_lea.hbm %s1223_s1, 2048 }
  0x21   : > { %788 = dma.vmem_to_smem (!%p1100_p13), %s205_s11, 16, %s992_s16, [#allocation5]  }
  0x22   : > { %p876_p12 = scmp.ne.s32.totalorder %s1223_s1, %s875_s25  ;;  %p882_p3 = scmp.lt.u32.totalorder %s875_s25, %s1223_s1 }
  0x24   : > { %p878_p0 = pnand %p876_p12, %p862_p1 }
  0x26   : > { %p879_p2 = pneg %p878_p0 }
  0x28   : > { %p884_p5 = pnand %p882_p3, %p879_p2 }
  0x2a   : > { %887 = shalt.err (!%p884_p5)
}
  0x2b   : > { %s888_s11 = scalar_lea.vmem %s1104_s14, 2048  ;;  %p896_p8 = scmp.lt.s32.totalorder %s1104_s14, %s1104_s14 }
  0x2c   : > { %p889_p6 = scmp.ne.s32.totalorder %s1104_s14, %s888_s11  ;;  %p897_p12 = scmp.lt.s32.totalorder %s888_s11, %s888_s11 }
  0x2e   : > { %p891_p7 = pnand %p889_p6, %p862_p1  ;;  %p898_p0 = por %p897_p12, %p896_p8 }
  0x30   : > { %p892_p9 = pneg %p891_p7 }
  0x32   : > { %p899_p4 = pnand %p898_p0, %p892_p9 }
  0x34   : > { %902 = shalt.err (!%p899_p4)
}
  0x35   : > { %s993_s13 = smov 128   ;;  %s994_s15 = smov 8  }
  0x36   : > { %791 = dma.hbm_to_vmem [thread:$0]  (!%p1100_p13), %s1223_s1, 2048, %s1104_s14, [#allocation3], %s993_s13, %s993_s13, %s994_s15  }
  0x37   : > { %260 = sbr.rel (%p1085_p10) target bundleno = 418 (0x1a2), region = 40 }
  0x3e   : > { %956 = dma.done.wait (%p1089_p11), [#allocation5], 16  }
  0x3f   : > { %958 = vsyncadd (%p1089_p11), [#allocation5], 4294967280 }
  0x40   : > { %960 = dma.done.wait (%p1089_p11), [#allocation3], 2048  }
  0x41   : > { %962 = vsyncadd (%p1089_p11), [#allocation3], 4294965248 }
  0x42   : > { %270 = sfence }
  0x43   : > { %v336_v0 = vld [vmem:[#allocation6] sm:$0xff]  ;;  %v337_v1 = vld [vmem:[#allocation6 + $0x8] sm:$0xff]  ;;  %v338_v2 = vld [vmem:[#allocation6 + $0x10] sm:$0xff]  ;;  %p309_p4 = scmp.lt.s32.totalorder %s981_s21, 1  ;;  %v995_v3 = vmov 0.0|0.0   ;;  %s1149_s7 = sld [smem:[#allocation2 + $0x3]] }
  0x44   : > { %751 = vmatprep.subr.bf16.mxu0 %v995_v3  ;;  %v752_v4 = vpack.c.bf16 %v337_v1, %v336_v0  ;;  %v339_v5 = vld [vmem:[#allocation6 + $0x18] sm:$0xff]  ;;  %vm996_vm0 = vmmov 0   ;;  %v997_v6 = vmov 0.0   ;;  %s680_s8 = sld [smem:[#allocation2 + $0x4]]  ;;  %v998_v8 = vmov 0   ;;  %v340_v9 = vld [vmem:[#allocation6 + $0x20] sm:$0xff] }
  0x45   : > { %s310_s12 = scalar_select %p309_p4, %s981_s21, 1  ;;  %748 = vmatprep.mubr.msk.f32.mxu0 %vm996_vm0, %v997_v6  ;;  %v755_v7 = vpack.c.bf16 %v339_v5, %v338_v2  ;;  %857 = vset.pattern.permute.xlu0 %v998_v8  ;;  %v341_v10 = vld [vmem:[#allocation6 + $0x28] sm:$0xff]  ;;  %v342_v14 = vld [vmem:[#allocation6 + $0x30] sm:$0xff]  ;;  %v343_v15 = vld [vmem:[#allocation6 + $0x38] sm:$0xff] }
  0x46   : > { %753 = vmatpush3.bf16.msra.mxu0 %v752_v4  ;;  %v758_v12 = vpack.c.bf16 %v341_v10, %v340_v9  ;;  %v761_v21 = vpack.c.bf16 %v343_v15, %v342_v14  ;;  %v344_v24 = vld [vmem:[#allocation6 + $0x40] sm:$0xff]  ;;  %v345_v25 = vld [vmem:[#allocation6 + $0x48] sm:$0xff]  ;;  %v346_v29 = vld [vmem:[#allocation6 + $0x50] sm:$0xff]  ;;  %s330_s16 = sld [smem:[#allocation2]]  ;;  %s677_s17 = sld [smem:[#allocation2 + $0x1]] }
  0x47   : > { %754 = vmatprep.subr.bf16.mxu0 %v995_v3  ;;  %s674_s14 = sshll.u32 %s310_s12, 3  ;;  %v764_v27 = vpack.c.bf16 %v345_v25, %v344_v24  ;;  %v347_v30 = vld [vmem:[#allocation6 + $0x58] sm:$0xff]  ;;  %v348_v32 = vld [vmem:[#allocation6 + $0x60] sm:$0xff]  ;;  %v349_v33 = vld [vmem:[#allocation6 + $0x68] sm:$0xff]  ;;  %s688_s12 = sld [smem:[#allocation2 + $0x8]] }
  0x48   : > { %s322_s27 = scalar_lea.vmem %s1225_s3, %s674_s14  ;;  %s329_s10 = scalar_lea.vmem %s1226_s4, %s674_s14  ;;  %v767_v31 = vpack.c.bf16 %v347_v30, %v346_v29  ;;  %v770_v34 = vpack.c.bf16 %v349_v33, %v348_v32  ;;  %v350_v35 = vld [vmem:[#allocation6 + $0x70] sm:$0xff]  ;;  %v351_v36 = vld [vmem:[#allocation6 + $0x78] sm:$0xff] }
  0x49   : > { %v335_v11 = vld [vmem:[%s322_s27] sm:$0xff]  ;;  %s315_s15 = scalar_lea.vmem %s1224_s2, %s674_s14  ;;  %v511_v17 = vstv %s1149_s7  ;;  %v773_v37 = vpack.c.bf16 %v351_v36, %v350_v35  ;;  %s689_s7 = sld [smem:[#allocation2 + $0x9]] }
  0x4a   : > { %756 = vmatpush3.bf16.msra.mxu0 %v755_v7  ;;  %vm429_vm1 = vcmp.gt.f32.partialorder %v335_v11, 0.0  ;;  %v422_v13 = vld [vmem:[%s315_s15] sm:$0xff]  ;;  %v515_v20 = vstv %s680_s8  ;;  %s690_s8 = sld [smem:[#allocation2 + $0xa]]  ;;  %s691_s14 = sld [smem:[#allocation2 + $0xb]] }
  0x4b   : > { %757 = vmatprep.subr.bf16.mxu0 %v995_v3  ;;  %v1161_v16 = vsel %vm429_vm1, 1.0, %v997_v6  ;;  %v514_v18 = vld [vmem:[%s329_s10] sm:$0xff]  ;;  %425 = vperm.xlu0 %857, %v422_v13   ;;  %s692_s24 = sld [smem:[#allocation2 + $0xc]]  ;;  %s693_s25 = sld [smem:[#allocation2 + $0xd]] }
  0x4c   : > { %v510_v19 = vsub.f32 1.0, %v1161_v16  ;;  %v516_v23 = vmul.f32 %v515_v20, %v514_v18  ;;  %v465_v10 = vstv %s677_s17  ;;  %s694_s27 = sld [smem:[#allocation2 + $0xe]]  ;;  %s678_s29 = sld [smem:[#allocation2 + $0x2]] }
  0x4d   : > { %v472_v25 = vstv %s688_s12  ;;  %s306_s9 = sand.u32 1, %s973_s19   ;;  %s696_s11 = sshll.u32 %s981_s21, 7 }
  0x4e   : > { %759 = vmatpush3.bf16.msra.mxu0 %v758_v12  ;;  %v512_v22 = vmul.f32 %v511_v17, %v510_v19  ;;  %s673_s10 = sshll.u32 %s306_s9, 3  ;;  %s525_s12 = scalar_lea.sflag [#allocation4], %s306_s9 }
  0x4f   : > { %760 = vmatprep.subr.bf16.mxu0 %v995_v3  ;;  %s308_s13 = scalar_lea.vmem [#allocation7], %s673_s10  ;;  %p1234_p10 = scmp.ne.s32.totalorder %s1229_s28, 0 }
  0x50   : > { %v513_v26 = vadd.f32 %v1161_v16, %v512_v22  ;;  %v489_v30 = vstv %s691_s14  ;;  %s539_s15 = sshll.u32 %s308_s13, 4  ;;  %s999_s21 = smov [#allocation7]   ;;  %s1177_s15 = int_to_ptr.vmem [resolvable:$true] %s539_s15 }
  0x51   : > { %s907_s14 = sshll.u32 %s999_s21, 4  ;;  %s908_s14 = int_to_ptr.vmem [resolvable:$false] %s907_s14 }
  0x52   : > { %762 = vmatpush3.bf16.msra.mxu0 %v761_v21  ;;  %v1166_v28 = vmul.f32 %v516_v23, %v513_v26  ;;  %v477_v23 = vstv %s689_s7  ;;  %v483_v26 = vstv %s690_s8  ;;  %s1175_s7 = scalar_lea.hbm %s1227_s5, %s696_s11  ;;  %s903_s8 = scalar_lea.vmem %s1177_s15, 128 }
  0x53   : > { %763 = vmatprep.subr.bf16.mxu0 %v995_v3  ;;  %p904_p8 = scmp.ne.s32.totalorder %s1177_s15, %s903_s8  ;;  %p910_p1 = scmp.lt.s32.totalorder %s1177_s15, %s908_s14 }
  0x55   : > { %p905_p11 = pnand %p904_p8, %p1234_p10 }
  0x56   : > { %765 = vmatpush3.bf16.msra.mxu0 %v764_v27 }
  0x57   : > { %766 = vmatprep.subr.bf16.mxu0 %v995_v3  ;;  %p906_p13 = pneg %p905_p11 }
  0x5a   : > { %768 = vmatpush3.bf16.msra.mxu0 %v767_v31 }
  0x5b   : > { %769 = vmatprep.subr.bf16.mxu0 %v995_v3 }
  0x5e   : > { %771 = vmatpush3.bf16.msra.mxu0 %v770_v34  ;;  %v495_v34 = vstv %s692_s24  ;;  %s909_s24 = scalar_lea.vmem %s908_s14, 256 }
  0x5f   : > { %772 = vmatprep.subr.bf16.mxu0 %v995_v3  ;;  %p911_p2 = scmp.lt.s32.totalorder %s909_s24, %s903_s8 }
  0x61   : > { %p912_p3 = por %p911_p2, %p910_p1 }
  0x62   : > { %774 = vmatpush3.bf16.msra.mxu0 %v773_v37 }
  0x63   : > { %p913_p5 = pnand %p912_p3, %p906_p13 }
  0x65   : > { %749 = vmatmul.mubr.f32.vlgmr.msra.gmra.mrb[0].mxu0 %v335_v11  ;;  %v467_v11 = vstv %s330_s16 }
  0xca   : > { %v426_v38 = vpop.permute.xlu0 %425 }
 0x138   : > { %v418_v39 = vpop.f32.mrb[0].mxu0 }
 0x139   : > { %v428_v40 = vadd.f32 %v426_v38, %v418_v39  ;;  %v750_v41 = vpop.f32.mrb[1].mxu0  ;;  %v501_v38 = vstv %s693_s25 }
 0x13b   : > { %v432_v42 = vmul.f32 0.15915494, %v428_v40 }
 0x13d   : > { %v433_v43 = vadd.f32 0.5, %v432_v42 }
 0x13f   : > { %v434_v44 = vfloor.f32 %v433_v43 }
 0x141   : > { %v435_v45 = vmul.f32 6.2831855, %v434_v44 }
 0x143   : > { %v436_v46 = vsub.f32 %v428_v40, %v435_v45  ;;  %v507_v45 = vstv %s694_s27 }
 0x145   : > { %v437_v47 = vmul.f32 %v436_v46, %v436_v46 }
 0x147   : > { %v438_v48 = vmul.f32 1.6059044e-10, %v437_v47  ;;  %v451_v49 = vmul.f32 -1.1470745e-11, %v437_v47 }
 0x149   : > { %v682_v50 = vadd.f32 -2.5052108e-08, %v438_v48  ;;  %v452_v51 = vadd.f32 2.0876756e-09, %v451_v49 }
 0x14b   : > { %v440_v52 = vmul.f32 %v682_v50, %v437_v47  ;;  %v453_v53 = vmul.f32 %v452_v51, %v437_v47 }
 0x14d   : > { %v441_v54 = vadd.f32 2.7557319e-06, %v440_v52  ;;  %v685_v55 = vadd.f32 -2.755732e-07, %v453_v53  ;;  %v520_v52 = vstv %s678_s29 }
 0x14f   : > { %v442_v56 = vmul.f32 %v441_v54, %v437_v47  ;;  %v455_v57 = vmul.f32 %v685_v55, %v437_v47 }
 0x151   : > { %v683_v58 = vadd.f32 -0.0001984127, %v442_v56  ;;  %v456_v59 = vadd.f32 2.4801588e-05, %v455_v57 }
 0x153   : > { %v444_v60 = vmul.f32 %v683_v58, %v437_v47  ;;  %v457_v61 = vmul.f32 %v456_v59, %v437_v47 }
 0x155   : > { %v445_v62 = vadd.f32 0.008333334, %v444_v60  ;;  %v686_v63 = vadd.f32 -0.0013888889, %v457_v61 }
 0x157   : > { %v446_v0 = vmul.f32 %v445_v62, %v437_v47  ;;  %v459_v1 = vmul.f32 %v686_v63, %v437_v47 }
 0x159   : > { %v684_v2 = vadd.f32 -0.16666667, %v446_v0  ;;  %v460_v3 = vadd.f32 0.041666668, %v459_v1 }
 0x15b   : > { %v448_v4 = vmul.f32 %v684_v2, %v437_v47  ;;  %v461_v5 = vmul.f32 %v460_v3, %v437_v47 }
 0x15d   : > { %v449_v6 = vmul.f32 %v448_v4, %v436_v46  ;;  %v687_v7 = vadd.f32 -0.5, %v461_v5 }
 0x15f   : > { %v450_v8 = vadd.f32 %v449_v6, %v436_v46  ;;  %v463_v9 = vmul.f32 %v687_v7, %v437_v47 }
 0x161   : > { %v464_v12 = vadd.f32 1.0, %v463_v9  ;;  %v466_v13 = vmul.f32 %v465_v10, %v450_v8 }
 0x163   : > { %v468_v14 = vmul.f32 %v467_v11, %v464_v12  ;;  %v470_v17 = vadd.f32 %v464_v12, %v464_v12 }
 0x165   : > { %v469_v15 = vadd.f32 %v468_v14, %v466_v13 }
 0x167   : > { %v474_v18 = vmul.f32 %v470_v17, %v469_v15  ;;  %v473_v31 = vmul.f32 %v472_v25, %v469_v15 }
 0x169   : > { %v475_v19 = vsub.f32 %v474_v18, %v467_v11 }
 0x16b   : > { %v480_v20 = vmul.f32 %v475_v19, %v470_v17  ;;  %v478_v27 = vmul.f32 %v477_v23, %v475_v19 }
 0x16d   : > { %v481_v21 = vsub.f32 %v480_v20, %v469_v15  ;;  %v479_v35 = vadd.f32 %v478_v27, %v473_v31 }
 0x16f   : > { %v486_v22 = vmul.f32 %v481_v21, %v470_v17  ;;  %v484_v32 = vmul.f32 %v483_v26, %v481_v21 }
 0x171   : > { %v487_v24 = vsub.f32 %v486_v22, %v475_v19  ;;  %v485_v39 = vadd.f32 %v484_v32, %v479_v35 }
 0x173   : > { %v492_v29 = vmul.f32 %v487_v24, %v470_v17  ;;  %v490_v36 = vmul.f32 %v489_v30, %v487_v24 }
 0x175   : > { %v493_v33 = vsub.f32 %v492_v29, %v481_v21  ;;  %v491_v42 = vadd.f32 %v490_v36, %v485_v39 }
 0x177   : > { %v498_v37 = vmul.f32 %v493_v33, %v470_v17  ;;  %v496_v40 = vmul.f32 %v495_v34, %v493_v33 }
 0x179   : > { %v499_v41 = vsub.f32 %v498_v37, %v487_v24  ;;  %v497_v46 = vadd.f32 %v496_v40, %v491_v42 }
 0x17b   : > { %v504_v43 = vmul.f32 %v499_v41, %v470_v17  ;;  %v502_v44 = vmul.f32 %v501_v38, %v499_v41 }
 0x17d   : > { %v505_v47 = vsub.f32 %v504_v43, %v493_v33  ;;  %v503_v48 = vadd.f32 %v502_v44, %v497_v46 }
 0x17f   : > { %v508_v49 = vmul.f32 %v507_v45, %v505_v47 }
 0x181   : > { %v509_v50 = vadd.f32 %v508_v49, %v503_v48 }
 0x183   : > { %v518_v51 = vmul.f32 %v1161_v16, %v509_v50 }
 0x185   : > { %v519_v53 = vadd.f32 %v518_v51, %v1166_v28 }
 0x187   : > { %v521_v54 = vadd.f32 %v520_v52, %v519_v53 }
 0x189   : > { %858 = vtanh.f32 %v521_v54 }
 0x193   : > { %v859_v16 = vpop.eup %858 }
 0x194   : > { %523 = vst [vmem:[%s308_s13] sm:$0xff] %v859_v16 }
 0x195   : > { %916 = shalt.err (!%p913_p5)
}
 0x196   : > { %s917_s25 = scalar_lea.hbm %s1175_s7, 128  ;;  %s921_s9 = scalar_lea.hbm %s1227_s5, 256 }
 0x197   : > { %p918_p6 = scmp.ne.s32.totalorder %s1175_s7, %s917_s25  ;;  %p922_p12 = scmp.lt.u32.totalorder %s1175_s7, %s1227_s5 }
 0x198   : > { %p923_p0 = scmp.lt.u32.totalorder %s921_s9, %s917_s25  ;;  %p925_p8 = scmp.lt.u32.totalorder %s917_s25, %s1175_s7 }
 0x199   : > { %p919_p7 = pnand %p918_p6, %p1234_p10 }
 0x19a   : > { %p924_p4 = por %p923_p0, %p922_p12 }
 0x19b   : > { %p920_p9 = pneg %p919_p7 }
 0x19c   : > { %p926_p11 = por %p925_p8, %p924_p4 }
 0x19e   : > { %p927_p13 = pnand %p926_p11, %p920_p9 }
 0x1a0   : > { %930 = shalt.err (!%p927_p13)
}
 0x1a1   : > { %783 = dma.vmem_to_hbm [thread:$0]  (%p1234_p10), %s1177_s15, 128, %s1175_s7, %s525_s12  }
 0x1a2 PF: > { %p800_p1 = scmp.ge.s32.totalorder %s989_s23, 2  ;;  %s551_s13 = sand.u32 1, %s969_s18  }
 0x1a3   : > { %p1235_p2 = scmp.ne.s32.totalorder %s1230_s30, 0  ;;  %s552_s16 = scalar_lea.sflag [#allocation4], %s551_s13 }
 0x1a5   : > { %p793_p3 = pnand %p800_p1, %p1235_p2 }
 0x1a7   : > { %964 = dma.done.wait (!%p793_p3), %s552_s16, 128  }
 0x1a8   : > { %966 = vsyncadd (!%p793_p3), %s552_s16, 4294967168  ;;  %s20_s23 = sadd.s32 1, %s989_s23   ;;  %s1236_s18 = smov %s973_s19 }
 0x1a9   : > { %p17_p5 = scmp.ge.s32.totalorder %s20_s23, 4   ;;  %s1237_s19 = smov %s977_s20 }
 0x1aa   : > { %s1238_s20 = smov %s1083_s6  ;;  %s1239_s21 = smov %s985_s22 }
 0x1ab   : > { %s1240_s22 = smov %s1242_s26  ;;  %19 = sbr.rel (!%p17_p5) target bundleno = 6 (0x6), region = 91 }
 0x1b2   :  { %557 = vsyncpa [#allocation3], 1 }
 0x1b3   :  { %559 = vsyncpa [#allocation3 + $0x1], 1 }
 0x1b4   :  { %560 = vsyncpa [#allocation4], 1 }
 0x1b5   :  { %562 = vsyncpa [#allocation4 + $0x1], 1 }
 0x1b6   :  { %563 = vsyncpa [#allocation5], 1 }
 0x1b7   :  { %565 = vsyncpa [#allocation5 + $0x1], 1 }

</bundles_post_ra>
